<compile_context>
chip_gen: v7x
topology: tpu7x:2x2x1
jax: 0.10.0
libtpu: 0.0.40
codegen_flags: <defaults>
</compile_context>

<pallas_src>
import functools

import jax
import jax.numpy as jnp
from jax.experimental import pallas as pl
from jax.experimental.pallas import tpu as pltpu

_LANES = 128
_SUBLANES = 8


def _cdiv(a, b):
    return (a + b - 1) // b


def _round_up(a, b):
    return _cdiv(a, b) * b


def _l1_log_loss_kernel(pred_ref, tgt_ref, out_ref, *, max_depth, eps,
                        tile_r, n_r_half, valid_rows, n_full_tiles,
                        mask_possible):
    s = pl.program_id(0)            # 2-way split ("parallel": both v7x TCs)
    r = pl.program_id(1)            # row-tile index within this split
    g = s * n_r_half + r            # global (unclamped) row-tile index

    # Zero this split's resident (1, 8, 128) accumulator on its first tile.
    @pl.when(r == 0)
    def _():
        out_ref[...] = jnp.zeros_like(out_ref)

    t = tgt_ref[...].astype(jnp.float32)        # (tile_r, 128)
    p = pred_ref[...].astype(jnp.float32)

    valid = jnp.logical_and(t > 0.0, t < max_depth)     # bool, no f32 cast
    # On valid lanes |log(p*v+eps) - log(t*v+eps)| == |log((p+eps)/(t+eps))|:
    # one log instead of two, no pre-log masking multiplies.  Invalid lanes may
    # produce NaN/Inf here; the where() (NOT a multiply) drops them to exact 0.
    d = jnp.abs(jnp.log((p + eps) / (t + eps)))
    d = jnp.where(valid, d, 0.0)

    def _fold(x):
        # (tile_r, 128) -> (8, 128) with VPU adds (slack in a mem-bound
        # kernel); the final cross-lane reduce is tiny JAX epilogue glue.
        return x.reshape(tile_r // _SUBLANES, _SUBLANES, _LANES).sum(axis=0)

    if mask_possible:   # static: only emitted if some tile can over-read
        @pl.when(g < n_full_tiles)          # fully in-bounds tiles: no mask
        def _():
            out_ref[0] = out_ref[0] + _fold(d)

        @pl.when(g >= n_full_tiles)         # over-reading / padding tiles only
        def _():
            row = g * tile_r + jax.lax.broadcasted_iota(
                jnp.int32, (tile_r, _LANES), 0)
            out_ref[0] = out_ref[0] + _fold(jnp.where(row < valid_rows, d, 0.0))
    else:
        out_ref[0] = out_ref[0] + _fold(d)


def l1_log_loss(pred, target, max_depth=10.0, eps=1e-3, block_rows=8192):
    """Masked log-depth L1 loss. pred/target: (..., H, W), e.g. (B, 1, H, W)."""
    assert pred.shape == target.shape, (pred.shape, target.shape)
    assert pred.ndim >= 2
    H, W = pred.shape[-2], pred.shape[-1]
    n_pix = H * W
    n_items = 1
    for dim in pred.shape[:-2]:
        n_items *= dim
    n_total = n_items * n_pix

    # Stream native dtype (no f32 upcast in HBM) over one flat pixel axis.
    pred_flat = pred.reshape(-1)
    tgt_flat = target.reshape(-1)

    r_main = n_total // _LANES          # lane-aligned rows streamed by kernel
    n_main = r_main * _LANES
    n_rem = n_total - n_main            # <128 tail summed in the JAX epilogue

    def _sub_mult(dt):
        # sublane packing multiple: 8 for 32-bit, 16 for bf16/f16, 32 for 8-bit
        return _SUBLANES * max(1, 4 // jnp.dtype(dt).itemsize)

    sub = max(_sub_mult(pred.dtype), _sub_mult(target.dtype))

    total = jnp.float32(0.0)

    if r_main > 0:
        # Aligned prefix only: no full-array pad pass.  When n_total is a
        # multiple of 128 this is the whole array (pure reshape).
        pred_main = pred_flat[:n_main].reshape(r_main, _LANES)
        tgt_main = tgt_flat[:n_main].reshape(r_main, _LANES)

        tile_r = max(sub, min(_round_up(block_rows, sub),
                              _round_up(r_main, sub)))
        n_tiles = _cdiv(r_main, tile_r)
        n_full_tiles = r_main // tile_r         # tiles fully inside r_main
        n_r_half = _cdiv(n_tiles, 2)            # row tiles per split
        mask_possible = (2 * n_r_half) > n_full_tiles
        max_tile = n_tiles - 1

        kernel = functools.partial(
            _l1_log_loss_kernel,
            max_depth=float(max_depth), eps=float(eps),
            tile_r=tile_r, n_r_half=n_r_half, valid_rows=r_main,
            n_full_tiles=n_full_tiles, mask_possible=mask_possible)

        def in_map(s, r):
            # Clamp so a fully-out-of-range tile (odd tile count) re-reads the
            # last valid tile; its rows are >= r_main so the kernel masks it.
            return (jnp.minimum(s * n_r_half + r, max_tile), 0)

        cost = pl.CostEstimate(
            flops=9 * n_main,
            transcendentals=1 * n_main,
            bytes_accessed=(n_main * (pred_main.dtype.itemsize
                                      + tgt_main.dtype.itemsize)
                            + 2 * _SUBLANES * _LANES * 4))

        partial_sums = pl.pallas_call(
            kernel,
            out_shape=jax.ShapeDtypeStruct((2, _SUBLANES, _LANES), jnp.float32),
            grid_spec=pltpu.PrefetchScalarGridSpec(
                num_scalar_prefetch=0,
                grid=(2, n_r_half),
                in_specs=[
                    pl.BlockSpec((tile_r, _LANES), in_map),
                    pl.BlockSpec((tile_r, _LANES), in_map),
                ],
                out_specs=pl.BlockSpec((1, _SUBLANES, _LANES),
                                       lambda s, r: (s, 0, 0)),
            ),
            compiler_params=pltpu.CompilerParams(
                dimension_semantics=("parallel", "arbitrary"),
                vmem_limit_bytes=48 << 20),
            cost_estimate=cost,
        )(pred_main, tgt_main)

        total = total + jnp.sum(partial_sums, dtype=jnp.float32)

    if n_rem > 0:
        # <128 trailing elements: negligible, keep in plain JAX.
        p_r = pred_flat[n_main:].astype(jnp.float32)
        t_r = tgt_flat[n_main:].astype(jnp.float32)
        v_r = jnp.logical_and(t_r > 0.0, t_r < max_depth)
        d_r = jnp.abs(jnp.log(p_r + eps) - jnp.log(t_r + eps))
        total = total + jnp.sum(jnp.where(v_r, d_r, 0.0))

    # per-map mean is /(H*W) and the batch mean is /n_items; since every map
    # has the same H*W this equals total_sum / (n_items * H * W).
    loss = total / jnp.float32(n_total)
    return loss, {"l1_loss": loss}


def _reference(pred, target, max_depth=10.0, eps=1e-3):
    pred = pred.astype(jnp.float32)
    target = target.astype(jnp.float32)
    valid = jnp.logical_and(target > 0, target < max_depth).astype(jnp.float32)
    loss = jnp.abs(jnp.log(pred * valid + eps) - jnp.log(target * valid + eps))
    loss = (loss * valid).mean(axis=(-1, -2))
    return loss.mean()


if __name__ == "__main__":
    key = jax.random.PRNGKey(0)
    k1, k2, k3, k4 = jax.random.split(key, 4)

    # Case 1: lane-aligned spatial size, f32 (no remainder; split-1 fully masked).
    B, C, H, W = 2, 1, 16, 128
    target = jax.random.uniform(k1, (B, C, H, W), jnp.float32,
                                minval=-1.0, maxval=12.0)
    pred = jax.random.uniform(k2, (B, C, H, W), jnp.float32,
                              minval=0.01, maxval=10.0)
    loss, aux = l1_log_loss(pred, target, max_depth=10.0)
    loss = jax.block_until_ready(loss)
    ref = _reference(pred, target, max_depth=10.0)
    assert jnp.allclose(loss, ref, rtol=1e-5, atol=1e-5), (loss, ref)
    assert jnp.allclose(aux["l1_loss"], loss)

    # Case 2: ragged spatial size (in-kernel row mask + JAX tail, no pad pass).
    H2, W2 = 15, 100
    target2 = jax.random.uniform(k3, (B, C, H2, W2), jnp.float32,
                                 minval=-1.0, maxval=12.0)
    pred2 = jax.random.uniform(k4, (B, C, H2, W2), jnp.float32,
                               minval=0.01, maxval=10.0)
    loss2, _ = l1_log_loss(pred2, target2, max_depth=10.0)
    loss2 = jax.block_until_ready(loss2)
    ref2 = _reference(pred2, target2, max_depth=10.0)
    assert jnp.allclose(loss2, ref2, rtol=1e-5, atol=1e-5), (loss2, ref2)

    # Case 3: bf16 inputs streamed in native dtype (bandwidth path).
    loss3, _ = l1_log_loss(pred.astype(jnp.bfloat16),
                           target.astype(jnp.bfloat16), max_depth=10.0)
    loss3 = jax.block_until_ready(loss3)
    ref3 = _reference(pred.astype(jnp.bfloat16),
                      target.astype(jnp.bfloat16), max_depth=10.0)
    assert jnp.allclose(loss3, ref3, rtol=1e-4, atol=1e-4), (loss3, ref3)

    # Case 4: several row tiles per split (multi-step accumulation, static
    # no-mask fast path on every tile).
    loss4, _ = l1_log_loss(pred, target, max_depth=10.0, block_rows=8)
    loss4 = jax.block_until_ready(loss4)
    assert jnp.allclose(loss4, ref, rtol=1e-5, atol=1e-5), (loss4, ref)

    print("KERNEL_OK")
</pallas_src>

<mosaic_0001>
module attributes {stable_mosaic.version = 11 : i64} {
  func.func @_l1_log_loss_kernel(%arg0: i32, %arg1: i32, %arg2: memref<32x128xf32, #tpu.memory_space<vmem>>, %arg3: memref<32x128xf32, #tpu.memory_space<vmem>>, %arg4: memref<1x8x128xf32, #tpu.memory_space<vmem>>) attributes {dimension_semantics = [#tpu.dimension_semantics<parallel>, #tpu.dimension_semantics<arbitrary>], iteration_bounds = array<i64: 2, 1>, scalar_prefetch = 0 : i64, scratch_operands = 0 : i64, tpu.core_type = #tpu.core_type<tc>, window_params = [{transform_indices = @transform_0, window_bounds = array<i64: 32, 128>}, {transform_indices = @transform_1, window_bounds = array<i64: 32, 128>}, {transform_indices = @transform_2, window_bounds = array<i64: 1, 8, 128>}]} {
    %c1_i32 = arith.constant 1 : i32
    %0 = arith.muli %arg0, %c1_i32 : i32
    %1 = arith.addi %0, %arg1 : i32
    %c0_i32 = arith.constant 0 : i32
    %2 = arith.cmpi eq, %arg1, %c0_i32 : i32
    %3 = arith.extui %2 : i1 to i32
    %c0_i32_0 = arith.constant 0 : i32
    %4 = arith.cmpi ne, %3, %c0_i32_0 : i32
    scf.if %4 {
      %cst_12 = arith.constant 0.000000e+00 : f32
      %27 = vector.broadcast %cst_12 : f32 to vector<1x8x128xf32>
      %c0_13 = arith.constant 0 : index
      %c0_14 = arith.constant 0 : index
      %c0_15 = arith.constant 0 : index
      %28 = vector.load %arg4[%c0_13, %c0_14, %c0_15] : memref<1x8x128xf32, #tpu.memory_space<vmem>>, vector<1x8x128xf32>
      tpu.vector_store %arg4[%c0_13, %c0_14, %c0_15], %27 {strides = array<i32>} : memref<1x8x128xf32, #tpu.memory_space<vmem>>, vector<1x8x128xf32>,
    } else {
    }
    %c0 = arith.constant 0 : index
    %c0_1 = arith.constant 0 : index
    %5 = vector.load %arg3[%c0, %c0_1] : memref<32x128xf32, #tpu.memory_space<vmem>>, vector<32x128xf32>
    %c0_2 = arith.constant 0 : index
    %c0_3 = arith.constant 0 : index
    %6 = vector.load %arg2[%c0_2, %c0_3] : memref<32x128xf32, #tpu.memory_space<vmem>>, vector<32x128xf32>
    %cst = arith.constant 0.000000e+00 : f32
    %7 = vector.broadcast %cst : f32 to vector<32x128xf32>
    %8 = arith.cmpf ogt, %5, %7 : vector<32x128xf32>
    %cst_4 = arith.constant 1.000000e+01 : f32
    %9 = vector.broadcast %cst_4 : f32 to vector<32x128xf32>
    %10 = arith.cmpf olt, %5, %9 : vector<32x128xf32>
    %11 = arith.andi %8, %10 : vector<32x128xi1>
    %cst_5 = arith.constant 1.000000e-03 : f32
    %12 = vector.broadcast %cst_5 : f32 to vector<32x128xf32>
    %13 = arith.addf %6, %12 : vector<32x128xf32>
    %cst_6 = arith.constant 1.000000e-03 : f32
    %14 = vector.broadcast %cst_6 : f32 to vector<32x128xf32>
    %15 = arith.addf %5, %14 : vector<32x128xf32>
    %16 = arith.divf %13, %15 : vector<32x128xf32>
    %17 = math.log %16 : vector<32x128xf32>
    %18 = math.absf %17 : vector<32x128xf32>
    %cst_7 = arith.constant 0.000000e+00 : f32
    %19 = vector.broadcast %cst_7 : f32 to vector<32x128xf32>
    %20 = arith.select %11, %18, %19 : vector<32x128xi1>, vector<32x128xf32>
    %c1_i32_8 = arith.constant 1 : i32
    %21 = arith.cmpi slt, %1, %c1_i32_8 : i32
    %22 = arith.extui %21 : i1 to i32
    %c0_i32_9 = arith.constant 0 : i32
    %23 = arith.cmpi ne, %22, %c0_i32_9 : i32
    scf.if %23 {
      %c0_12 = arith.constant 0 : index
      %c0_13 = arith.constant 0 : index
      %c0_14 = arith.constant 0 : index
      %27 = vector.load %arg4[%c0_12, %c0_13, %c0_14] : memref<1x8x128xf32, #tpu.memory_space<vmem>>, vector<1x8x128xf32>
      %28 = vector.shape_cast %27 : vector<1x8x128xf32> to vector<8x128xf32>
      %29 = vector.shape_cast %20 : vector<32x128xf32> to vector<4x8x128xf32>
      %cst_15 = arith.constant dense<0.000000e+00> : vector<8x128xf32>
      %30 = vector.multi_reduction <add>, %29, %cst_15 [0] : vector<4x8x128xf32> to vector<8x128xf32>
      %31 = arith.addf %28, %30 : vector<8x128xf32>
      %c0_16 = arith.constant 0 : index
      %c0_17 = arith.constant 0 : index
      %c0_18 = arith.constant 0 : index
      %32 = vector.load %arg4[%c0_16, %c0_17, %c0_18] : memref<1x8x128xf32, #tpu.memory_space<vmem>>, vector<1x8x128xf32>
      %33 = vector.shape_cast %32 : vector<1x8x128xf32> to vector<8x128xf32>
      %34 = vector.shape_cast %31 : vector<8x128xf32> to vector<1x8x128xf32>
      tpu.vector_store %arg4[%c0_16, %c0_17, %c0_18], %34 {strides = array<i32>} : memref<1x8x128xf32, #tpu.memory_space<vmem>>, vector<1x8x128xf32>,
    } else {
    }
    %c1_i32_10 = arith.constant 1 : i32
    %24 = arith.cmpi sge, %1, %c1_i32_10 : i32
    %25 = arith.extui %24 : i1 to i32
    %c0_i32_11 = arith.constant 0 : i32
    %26 = arith.cmpi ne, %25, %c0_i32_11 : i32
    scf.if %26 {
      %c32_i32 = arith.constant 32 : i32
      %27 = arith.muli %1, %c32_i32 : i32
      %28 = tpu.iota {dimensions = array<i32: 0>} : vector<32x128xi32>
      %29 = vector.broadcast %27 : i32 to vector<32x128xi32>
      %30 = arith.addi %29, %28 : vector<32x128xi32>
      %c0_12 = arith.constant 0 : index
      %c0_13 = arith.constant 0 : index
      %c0_14 = arith.constant 0 : index
      %31 = vector.load %arg4[%c0_12, %c0_13, %c0_14] : memref<1x8x128xf32, #tpu.memory_space<vmem>>, vector<1x8x128xf32>
      %32 = vector.shape_cast %31 : vector<1x8x128xf32> to vector<8x128xf32>
      %c32_i32_15 = arith.constant 32 : i32
      %33 = vector.broadcast %c32_i32_15 : i32 to vector<32x128xi32>
      %34 = arith.cmpi slt, %30, %33 : vector<32x128xi32>
      %cst_16 = arith.constant 0.000000e+00 : f32
      %35 = vector.broadcast %cst_16 : f32 to vector<32x128xf32>
      %36 = arith.select %34, %20, %35 : vector<32x128xi1>, vector<32x128xf32>
      %37 = vector.shape_cast %36 : vector<32x128xf32> to vector<4x8x128xf32>
      %cst_17 = arith.constant dense<0.000000e+00> : vector<8x128xf32>
      %38 = vector.multi_reduction <add>, %37, %cst_17 [0] : vector<4x8x128xf32> to vector<8x128xf32>
      %39 = arith.addf %32, %38 : vector<8x128xf32>
      %c0_18 = arith.constant 0 : index
      %c0_19 = arith.constant 0 : index
      %c0_20 = arith.constant 0 : index
      %40 = vector.load %arg4[%c0_18, %c0_19, %c0_20] : memref<1x8x128xf32, #tpu.memory_space<vmem>>, vector<1x8x128xf32>
      %41 = vector.shape_cast %40 : vector<1x8x128xf32> to vector<8x128xf32>
      %42 = vector.shape_cast %39 : vector<8x128xf32> to vector<1x8x128xf32>
      tpu.vector_store %arg4[%c0_18, %c0_19, %c0_20], %42 {strides = array<i32>} : memref<1x8x128xf32, #tpu.memory_space<vmem>>, vector<1x8x128xf32>,
    } else {
    }
    return
  }
  func.func @transform_0(%arg0: i32, %arg1: i32) -> (i32, i32) {
    %c1_i32 = arith.constant 1 : i32
    %0 = arith.muli %arg0, %c1_i32 : i32
    %1 = arith.addi %0, %arg1 : i32
    %c0_i32 = arith.constant 0 : i32
    %2 = arith.minsi %1, %c0_i32 : i32
    %c0_i32_0 = arith.constant 0 : i32
    %c0_i32_1 = arith.constant 0 : i32
    return %2, %c0_i32_0 : i32, i32
  }
  func.func @transform_1(%arg0: i32, %arg1: i32) -> (i32, i32) {
    %c1_i32 = arith.constant 1 : i32
    %0 = arith.muli %arg0, %c1_i32 : i32
    %1 = arith.addi %0, %arg1 : i32
    %c0_i32 = arith.constant 0 : i32
    %2 = arith.minsi %1, %c0_i32 : i32
    %c0_i32_0 = arith.constant 0 : i32
    %c0_i32_1 = arith.constant 0 : i32
    return %2, %c0_i32_0 : i32, i32
  }
  func.func @transform_2(%arg0: i32, %arg1: i32) -> (i32, i32, i32) {
    %c0_i32 = arith.constant 0 : i32
    %c0_i32_0 = arith.constant 0 : i32
    %c0_i32_1 = arith.constant 0 : i32
    return %arg0, %c0_i32, %c0_i32_0 : i32, i32, i32
  }
}

</mosaic_0001>

<bundles_post_ra>
// kernel: tpu_custom_call.1
= control target key start
LH: loop header
LB: loop body
LE: loop exit
PB: predicated region body
PF: predicated region fallthrough
CT: control target
= control target key end

     0   :  { %7 = vsyncpa [#allocation3], 0  ;;  %s987_s0 = inlined_call_operand.hbm [shape: f32[32,128], index: 0, kind: input, shape index: {}]   ;;  %s988_s1 = inlined_call_operand.hbm [shape: f32[32,128], index: 1, kind: input, shape index: {}]   ;;  %s989_s2 = inlined_call_operand.hbm [shape: f32[2,8,128], index: 2, kind: output, shape index: {}]  }
   0x1   :  { %9 = vsyncpa [#allocation3 + $0x1], 0 }
   0x2   :  { %10 = vsyncpa [#allocation6], 0 }
   0x3   :  { %12 = vsyncpa [#allocation6 + $0x1], 0 }
   0x4   :  { %13 = vsyncpa [#allocation4], 0 }
   0x5   :  { %15 = vsyncpa [#allocation4 + $0x1], 0  ;;  %s775_s9 = smov 0   ;;  %s777_s10 = smov 0  }
   0x6   :  { %s779_s11 = smov 0   ;;  %s781_s12 = smov 0  }
   0x7   :  { %s783_s13 = smov 0   ;;  %s785_s14 = smov 0  }
   0x8   :  { %s787_s15 = smov 0   ;;  %s789_s16 = smov 0  }
   0x9 LB: > { %s452_s17 = sadd.s32 4294967295, %s752_s16   ;;  %s453_s18 = sadd.s32 4294967294, %s752_s16   ;;  %s752_s16 = sphi %s789_s16, %s21_s16   ;;  %s748_s15 = sphi %s787_s15, %s1008_s15   ;;  %s744_s14 = sphi %s785_s14, %s1007_s14   ;;  %s740_s13 = sphi %s783_s13, %s977_s13   ;;  %s736_s12 = sphi %s781_s12, %s1006_s12   ;;  %s732_s11 = sphi %s779_s11, %s1005_s11   ;;  %s728_s10 = sphi %s777_s10, %s1004_s10   ;;  %s724_s9 = sphi %s775_s9, %s1003_s9  }
   0xa   : > { %s33_s19 = sadd.s32 1, %s748_s15  ;;  %p721_p1 = scmp.ne.s32.totalorder %s740_s13, 0 }
   0xb   : > { %p35_p0 = scmp.ge.s32.totalorder %s33_s19, 2  ;;  %p54_p2 = scmp.eq.s32.totalorder %s752_s16, 0 }
   0xc   : > { %p59_p3 = scmp.ne.s32.totalorder %s740_s13, %s736_s12  ;;  %p60_p5 = scmp.eq.s32.totalorder %s452_s17, 0 }
   0xd   : > { %s1010_s19 = smov (%p35_p0, %s33_s19), 0  ;;  %p821_p4 = por %p721_p1, %p54_p2 }
   0xe   : > { %p825_p6 = por %p60_p5, %p59_p3  ;;  %s101_s22 = ssub.s32 %s748_s15, %s1010_s19 }
   0xf   : > { %p102_p7 = scmp.eq.s32.totalorder %s101_s22, 0  ;;  %s104_s23 = sadd.s32 1, %s732_s11 }
  0x10   : > { %s993_s21 = scalar_select %p825_p6, 1, 0 }
  0x11   : > { %s833_s24 = scalar_select %p102_p7, %s732_s11, %s104_s23  }
  0x12   : > { %p114_p8 = scmp.ne.s32.totalorder %s732_s11, %s728_s10  ;;  %p115_p9 = scmp.eq.s32.totalorder %s452_s17, 1 }
  0x13   : > { %p120_p10 = scmp.ne.s32.totalorder %s728_s10, %s724_s9  ;;  %p121_p11 = scmp.eq.s32.totalorder %s453_s18, 1 }
  0x14   : > { %p839_p12 = por %p115_p9, %p114_p8  ;;  %p492_p1 = scmp.lt.s32.totalorder %s752_s16, 2 }
  0x15   : > { %p844_p0 = por %p121_p11, %p120_p10  ;;  %s754_s27 = smov [#allocation2]  }
  0x16   : > { %s994_s25 = scalar_select %p839_p12, 1, 0 }
  0x17   : > { %s995_s26 = scalar_select %p844_p0, 1, 0 }
  0x18   : > { %s155_s28 = sshll.u32 %s754_s27, 4  ;;  %p851_p2 = pnand %p492_p1, %p821_p4  ;;  %s156_s28 = int_to_ptr.vmem [resolvable:$true] %s155_s28 }
  0x19   : > { %s585_s4 = scalar_lea.hbm %s987_s0, 512 }
  0x1a   : > { %p586_p3 = scmp.ne.s32.totalorder %s987_s0, %s585_s4  ;;  %p587_p5 = pneg %p851_p2 }
  0x1b   : > { %p592_p8 = scmp.lt.u32.totalorder %s585_s4, %s585_s4  ;;  %p594_p9 = scmp.lt.u32.totalorder %s585_s4, %s987_s0 }
  0x1c   : > { %p588_p7 = pnand %p587_p5, %p586_p3 }
  0x1d   : > { %p595_p10 = por %p594_p9, %p592_p8 }
  0x1e   : > { %p589_p4 = pneg %p588_p7 }
  0x20   : > { %p596_p11 = pnand %p595_p10, %p589_p4 }
  0x22   : > { %599 = shalt.err (!%p596_p11)
}
  0x23   : > { %s600_s12 = scalar_lea.vmem %s156_s28, 512  ;;  %s607_s17 = scalar_lea.vmem %s156_s28, 1024 }
  0x24   : > { %p601_p1 = scmp.ne.s32.totalorder %s156_s28, %s600_s12  ;;  %p608_p12 = scmp.lt.s32.totalorder %s156_s28, %s156_s28 }
  0x25   : > { %p609_p6 = scmp.lt.s32.totalorder %s607_s17, %s600_s12 }
  0x26   : > { %p603_p13 = pnand %p601_p1, %p587_p5 }
  0x27   : > { %p610_p3 = por %p609_p6, %p608_p12 }
  0x28   : > { %p604_p0 = pneg %p603_p13 }
  0x2a   : > { %p611_p7 = pnand %p610_p3, %p604_p0 }
  0x2c   : > { %614 = shalt.err (!%p611_p7)
}
  0x2d   : > { %s755_s18 = smov 128   ;;  %s756_s20 = smov 8  }
  0x2e   : > { %484 = dma.hbm_to_vmem [thread:$0]  (!%p851_p2), %s987_s0, 512, %s156_s28, [#allocation3], %s755_s18, %s755_s18, %s756_s20  }
  0x2f   : > { %p462_p13 = scmp.ge.s32.totalorder %s752_s16, 1  ;;  %p187_p4 = scmp.lt.s32.totalorder %s752_s16, 3 }
  0x30   : > { %s757_s30 = smov [#allocation5]   ;;  %s615_s6 = scalar_lea.hbm %s988_s1, 512 }
  0x31   : > { %p882_p8 = pnand %p462_p13, %p187_p4  ;;  %s179_s3 = sshll.u32 %s757_s30, 4  ;;  %s180_s3 = int_to_ptr.vmem [resolvable:$true] %s179_s3 }
  0x32   : > { %p616_p6 = scmp.ne.s32.totalorder %s988_s1, %s615_s6  ;;  %p622_p9 = scmp.lt.u32.totalorder %s615_s6, %s615_s6 }
  0x33   : > { %s997_s27 = scalar_select %p882_p8, 1, 0 }
  0x34   : > { %p618_p12 = pnand %p616_p6, %p587_p5  ;;  %p624_p10 = scmp.lt.u32.totalorder %s615_s6, %s988_s1 }
  0x36   : > { %p619_p0 = pneg %p618_p12  ;;  %p625_p11 = por %p624_p10, %p622_p9 }
  0x38   : > { %p626_p1 = pnand %p625_p11, %p619_p0 }
  0x3a   : > { %629 = shalt.err (!%p626_p1)
}
  0x3b   : > { %s630_s17 = scalar_lea.vmem %s180_s3, 512  ;;  %s637_s22 = scalar_lea.vmem %s180_s3, 1024 }
  0x3c   : > { %p631_p3 = scmp.ne.s32.totalorder %s180_s3, %s630_s17  ;;  %p638_p4 = scmp.lt.s32.totalorder %s180_s3, %s180_s3 }
  0x3d   : > { %p639_p8 = scmp.lt.s32.totalorder %s637_s22, %s630_s17 }
  0x3e   : > { %p633_p7 = pnand %p631_p3, %p587_p5 }
  0x3f   : > { %p640_p6 = por %p639_p8, %p638_p4 }
  0x40   : > { %p634_p13 = pneg %p633_p7 }
  0x42   : > { %p641_p12 = pnand %p640_p6, %p634_p13 }
  0x44   : > { %644 = shalt.err (!%p641_p12)
}
  0x45   : > { %487 = dma.hbm_to_vmem [thread:$0]  (!%p851_p2), %s988_s1, 512, %s180_s3, [#allocation6], %s755_s18, %s755_s18, %s756_s20  }
  0x46   : > { %p998_p0 = scmp.ne.s32.totalorder %s997_s27, 0 }
  0x47   : > { %s193_s4 = sand.u32 (!%p998_p0), 1, %s740_s13   ;;  %p999_p5 = scmp.ne.s32.totalorder (!%p998_p0), %s993_s21, 0 }
  0x48   : > { %191 = sbr.rel (%p998_p0) target bundleno = 169 (0xa9), region = 28  ;;  %s463_s5 = sshll.u32 (!%p998_p0), %s193_s4, 5 }
  0x49   : > { %s194_s6 = scalar_lea.sflag (!%p998_p0), [#allocation3], %s193_s4  ;;  %s197_s7 = scalar_lea.vmem (!%p998_p0), [#allocation2], %s463_s5 }
  0x4f   : > { %710 = dma.done.wait (%p999_p5), %s194_s6, 512  }
  0x50   : > { %712 = vsyncadd (%p999_p5), %s194_s6, 4294966784  ;;  %s203_s29 = scalar_lea.sflag [#allocation6], %s193_s4  ;;  %s206_s8 = scalar_lea.vmem [#allocation5], %s463_s5 }
  0x51   : > { %714 = dma.done.wait (%p999_p5), %s203_s29, 512  }
  0x52   : > { %716 = vsyncadd (%p999_p5), %s203_s29, 4294966784  ;;  %s229_s18 = sand.u32 1, %s728_s10   ;;  %v758_v0 = vmov 0.0   ;;  %v246_v1 = vld [vmem:[%s206_s8] sm:$0xff]  ;;  %v247_v2 = vld [vmem:[%s206_s8 + $0x8] sm:$0xff]  ;;  %p466_p2 = scmp.ge.s32.totalorder %s744_s14, 1 }
  0x53   : > { %s465_s20 = sshll.u32 %s229_s18, 3  ;;  %v248_v3 = vld [vmem:[%s206_s8 + $0x10] sm:$0xff]  ;;  %v249_v4 = vld [vmem:[%s206_s8 + $0x18] sm:$0xff]  ;;  %v270_v5 = vadd.f32 0.001, %v246_v1  ;;  %v250_v9 = vld [vmem:[%s197_s7] sm:$0xff] }
  0x54   : > { %s923_s27 = scalar_lea.vmem [#allocation7], %s465_s20  ;;  %v271_v6 = vadd.f32 0.001, %v247_v2  ;;  %v272_v7 = vadd.f32 0.001, %v248_v3  ;;  %v251_v10 = vld [vmem:[%s197_s7 + $0x8] sm:$0xff] }
  0x55   : > { %245 = vst [vmem:[%s923_s27] sm:$0xff] %v758_v0  ;;  %v273_v8 = vadd.f32 0.001, %v249_v4  ;;  %569 = vrcp.f32 %v270_v5  ;;  %v252_v11 = vld [vmem:[%s197_s7 + $0x10] sm:$0xff]  ;;  %v253_v12 = vld [vmem:[%s197_s7 + $0x18] sm:$0xff]  ;;  %v266_v13 = vadd.f32 0.001, %v250_v9 }
  0x56   : > { %571 = vrcp.f32 %v271_v6  ;;  %v267_v14 = vadd.f32 0.001, %v251_v10  ;;  %v268_v15 = vadd.f32 0.001, %v252_v11  ;;  %v269_v17 = vadd.f32 0.001, %v253_v12 }
  0x57   : > { %573 = vrcp.f32 %v272_v7  ;;  %vm254_vm0 = vcmp.gt.f32.partialorder %v246_v1, 0.0  ;;  %vm258_vm1 = vcmp.lt.f32.partialorder %v246_v1, 10.0  ;;  %vm255_vm2 = vcmp.gt.f32.partialorder %v247_v2, 0.0 }
  0x58   : > { %575 = vrcp.f32 %v273_v8  ;;  %vm259_vm3 = vcmp.lt.f32.partialorder %v247_v2, 10.0  ;;  %vm256_vm4 = vcmp.gt.f32.partialorder %v248_v3, 0.0  ;;  %vm260_vm5 = vcmp.lt.f32.partialorder %v248_v3, 10.0  ;;  %vm262_vm8 = vmand %vm254_vm0, %vm258_vm1 }
  0x59   : > { %vm257_vm6 = vcmp.gt.f32.partialorder %v249_v4, 0.0  ;;  %vm261_vm7 = vcmp.lt.f32.partialorder %v249_v4, 10.0  ;;  %vm263_vm9 = vmand %vm255_vm2, %vm259_vm3 }
  0x5a   : > { %vm264_vm10 = vmand %vm256_vm4, %vm260_vm5 }
  0x5b   : > { %vm265_vm11 = vmand %vm257_vm6, %vm261_vm7 }
  0x5c   : > { %v302_v43 = vld [vmem:[%s923_s27] sm:$0xff] (!%p466_p2) }
  0x5f   : > { %v570_v16 = vpop.eup %569 }
  0x60   : > { %v572_v18 = vpop.eup %571  ;;  %v275_v19 = vmul.f32 %v570_v16, %v266_v13 }
  0x61   : > { %v574_v20 = vpop.eup %573  ;;  %v277_v21 = vmul.f32 %v572_v18, %v267_v14 }
  0x62   : > { %v576_v22 = vpop.eup %575  ;;  %v279_v23 = vmul.f32 %v574_v20, %v268_v15  ;;  %577 = vlog2.f32 %v275_v19 }
  0x63   : > { %v281_v24 = vmul.f32 %v576_v22, %v269_v17  ;;  %579 = vlog2.f32 %v277_v21 }
  0x64   : > { %581 = vlog2.f32 %v279_v23 }
  0x65   : > { %583 = vlog2.f32 %v281_v24 }
  0x6c   : > { %v578_v25 = vpop.eup %577 }
  0x6d   : > { %v580_v26 = vpop.eup %579  ;;  %v283_v27 = vmul.f32 0.6931472, %v578_v25 }
  0x6e   : > { %v582_v28 = vpop.eup %581  ;;  %v285_v29 = vmul.f32 0.6931472, %v580_v26  ;;  %301 = sbr.rel (%p466_p2) target bundleno = 124 (0x7c), region = 44 }
  0x6f   : > { %v584_v30 = vpop.eup %583  ;;  %v287_v31 = vmul.f32 0.6931472, %v582_v28  ;;  %v290_v32 = vand.u32 2147483647, %v283_v27 }
  0x70   : > { %v289_v33 = vmul.f32 0.6931472, %v584_v30  ;;  %v291_v34 = vand.u32 2147483647, %v285_v29 }
  0x71   : > { %v292_v35 = vand.u32 2147483647, %v287_v31  ;;  %v294_v36 = vsel %vm262_vm8, %v290_v32, 0.0 }
  0x72   : > { %v293_v37 = vand.u32 2147483647, %v289_v33  ;;  %v295_v38 = vsel %vm263_vm9, %v291_v34, 0.0 }
  0x73   : > { %v296_v39 = vsel %vm264_vm10, %v292_v35, 0.0  ;;  %v303_v41 = vadd.f32 (!%p466_p2), %v295_v38, %v294_v36 }
  0x74   : > { %v297_v40 = vsel %vm265_vm11, %v293_v37, 0.0 }
  0x75   : > { %v304_v42 = vadd.f32 %v303_v41, %v296_v39 }
  0x77   : > { %v305_v44 = vadd.f32 %v304_v42, %v297_v40 }
  0x79   : > { %v306_v45 = vadd.f32 %v305_v44, %v302_v43 }
  0x7b   : > { %307 = vst [vmem:[%s923_s27] sm:$0xff] %v306_v45 }
  0x7c PF: > { %p467_p8 = scmp.lt.s32.totalorder %s744_s14, 1 }
  0x7d   : > { %s468_s21 = sshll.u32 (!%p467_p8), %s744_s14, 5  ;;  %v313_v46 = vlaneseq (!%p467_p8) }
  0x7e   : > { %311 = sbr.rel (%p467_p8) target bundleno = 144 (0x90), region = 48  ;;  %v318_v47 = vstv (!%p467_p8), %s468_s21 }
  0x7f   : > { %v314_v48 = vshrl.u32 (!%p467_p8), %v313_v46, 7 }
  0x81   : > { %v315_v49 = vadd.s32 (!%p467_p8), 8, %v314_v48  ;;  %v316_v50 = vadd.s32 (!%p467_p8), 16, %v314_v48  ;;  %v317_v51 = vadd.s32 (!%p467_p8), 24, %v314_v48  ;;  %v319_v52 = vadd.s32 (!%p467_p8), %v318_v47, %v314_v48 }
  0x82   : > { %v323_v62 = vld [vmem:[%s923_s27] sm:$0xff] (!%p467_p8) }
  0x83   : > { %v320_v53 = vadd.s32 (!%p467_p8), %v318_v47, %v315_v49  ;;  %v321_v54 = vadd.s32 (!%p467_p8), %v318_v47, %v316_v50  ;;  %v322_v55 = vadd.s32 (!%p467_p8), %v318_v47, %v317_v51  ;;  %vm324_vm12 = vcmp.lt.s32.totalorder (!%p467_p8), %v319_v52, 32 }
  0x84   : > { %v328_v56 = vsel (!%p467_p8), %vm324_vm12, %v294_v36, 0.0 }
  0x85   : > { %vm325_vm13 = vcmp.lt.s32.totalorder %v320_v53, 32  ;;  %vm326_vm14 = vcmp.lt.s32.totalorder %v321_v54, 32  ;;  %vm327_vm15 = vcmp.lt.s32.totalorder %v322_v55, 32 }
  0x86   : > { %v329_v57 = vsel %vm325_vm13, %v295_v38, 0.0  ;;  %v330_v58 = vsel %vm326_vm14, %v296_v39, 0.0  ;;  %v331_v60 = vsel %vm327_vm15, %v297_v40, 0.0 }
  0x87   : > { %v332_v59 = vadd.f32 %v329_v57, %v328_v56 }
  0x89   : > { %v333_v61 = vadd.f32 %v332_v59, %v330_v58 }
  0x8b   : > { %v334_v63 = vadd.f32 %v333_v61, %v331_v60 }
  0x8d   : > { %v335_v0 = vadd.f32 %v334_v63, %v323_v62 }
  0x8f   : > { %336 = vst [vmem:[%s923_s27] sm:$0xff] %v335_v0 }
  0x90 PF: > { %s470_s3 = sshll.u32 %s744_s14, 7  ;;  %s351_s22 = sshll.u32 %s923_s27, 4  ;;  %s352_s22 = int_to_ptr.vmem [resolvable:$true] %s351_s22 }
  0x91   : > { %s937_s17 = scalar_lea.hbm %s989_s2, %s470_s3  ;;  %s338_s23 = scalar_lea.sflag [#allocation4], %s229_s18 }
  0x92   : > { %s645_s30 = scalar_lea.vmem %s352_s22, 128  ;;  %p1000_p10 = scmp.ne.s32.totalorder %s994_s25, 0 }
  0x93   : > { %p646_p9 = scmp.ne.s32.totalorder %s352_s22, %s645_s30  ;;  %s759_s4 = smov [#allocation7]  }
  0x94   : > { %s649_s5 = sshll.u32 %s759_s4, 4  ;;  %s650_s5 = int_to_ptr.vmem [resolvable:$false] %s649_s5 }
  0x95   : > { %p647_p11 = pnand %p646_p9, %p1000_p10  ;;  %s651_s6 = scalar_lea.vmem %s650_s5, 256 }
  0x96   : > { %p652_p3 = scmp.lt.s32.totalorder %s352_s22, %s650_s5  ;;  %p653_p7 = scmp.lt.s32.totalorder %s651_s6, %s645_s30 }
  0x97   : > { %p648_p1 = pneg %p647_p11 }
  0x98   : > { %p654_p13 = por %p653_p7, %p652_p3 }
  0x9a   : > { %p655_p4 = pnand %p654_p13, %p648_p1 }
  0x9c   : > { %658 = shalt.err (!%p655_p4)
}
  0x9d   : > { %s659_s14 = scalar_lea.hbm %s937_s17, 128  ;;  %s663_s8 = scalar_lea.hbm %s989_s2, 256 }
  0x9e   : > { %p660_p6 = scmp.ne.s32.totalorder %s937_s17, %s659_s14  ;;  %p664_p5 = scmp.lt.u32.totalorder %s937_s17, %s989_s2 }
  0x9f   : > { %p665_p2 = scmp.lt.u32.totalorder %s663_s8, %s659_s14  ;;  %p667_p9 = scmp.lt.u32.totalorder %s659_s14, %s937_s17 }
  0xa0   : > { %p661_p12 = pnand %p660_p6, %p1000_p10 }
  0xa1   : > { %p666_p8 = por %p665_p2, %p664_p5 }
  0xa2   : > { %p662_p0 = pneg %p661_p12 }
  0xa3   : > { %p668_p11 = por %p667_p9, %p666_p8 }
  0xa5   : > { %p669_p1 = pnand %p668_p11, %p662_p0 }
  0xa7   : > { %672 = shalt.err (!%p669_p1)
}
  0xa8   : > { %479 = dma.vmem_to_hbm [thread:$0]  (%p1000_p10), %s352_s22, 128, %s937_s17, %s338_s23  }
  0xa9 PF: > { %s363_s27 = sand.u32 1, %s724_s9   ;;  %p1001_p3 = scmp.ne.s32.totalorder %s995_s26, 0 }
  0xaa   : > { %p1002_p7 = scmp.ge.s32.totalorder %s752_s16, 2  ;;  %s364_s21 = scalar_lea.sflag [#allocation4], %s363_s27 }
  0xac   : > { %p489_p13 = pnand %p1002_p7, %p1001_p3 }
  0xae   : > { %718 = dma.done.wait (!%p489_p13), %s364_s21, 128  }
  0xaf   : > { %720 = vsyncadd (!%p489_p13), %s364_s21, 4294967168  ;;  %s21_s16 = sadd.s32 1, %s752_s16   ;;  %s1003_s9 = smov %s728_s10 }
  0xb0   : > { %p18_p4 = scmp.ge.s32.totalorder %s21_s16, 4   ;;  %s1004_s10 = smov %s732_s11 }
  0xb1   : > { %s1005_s11 = smov %s833_s24  ;;  %s1006_s12 = smov %s740_s13 }
  0xb2   : > { %s977_s13 = smov 0   ;;  %s1007_s14 = smov %s748_s15 }
  0xb3   : > { %s1008_s15 = smov %s1010_s19  ;;  %20 = sbr.rel (!%p18_p4) target bundleno = 9 (0x9), region = 98 }
  0xba   :  { %369 = vsyncpa [#allocation3], 1 }
  0xbb   :  { %371 = vsyncpa [#allocation3 + $0x1], 1 }
  0xbc   :  { %372 = vsyncpa [#allocation6], 1 }
  0xbd   :  { %374 = vsyncpa [#allocation6 + $0x1], 1 }
  0xbe   :  { %375 = vsyncpa [#allocation4], 1 }
  0xbf   :  { %377 = vsyncpa [#allocation4 + $0x1], 1 }

</bundles_post_ra>
